<compile_context>
chip_gen: v7x
topology: tpu7x:2x2x1
jax: 0.10.0
libtpu: 0.0.40
codegen_flags: <defaults>
</compile_context>

<pallas_src>
import functools
import math

import jax
import jax.numpy as jnp
from jax.experimental import pallas as pl
from jax.experimental.pallas import tpu as pltpu

LOG_SIG_MAX = 2.0
LOG_SIG_MIN = -20.0
LOG_2PI = math.log(2.0 * math.pi)


def _tanh_gaussian_policy_kernel(
    obs_ref,    # (obs_dim, tile_b)   matmul_dtype
    eps_ref,    # (A, tile_b)         f32
    zb1_ref,    # (hidden, 1)         f32   per-task  stop_grad(z) @ W1_z + b1
    w1_ref,     # (hidden, obs_dim)   matmul_dtype    W1_obs^T
    w2_ref,     # (hidden, hidden)    matmul_dtype    W2^T
    b2_ref,     # (hidden, 1)         f32
    wh_ref,     # (2*pad_a, hidden)   f32   rows [0:A]=Wm^T, [pad_a:pad_a+A]=Ws^T
    bh_ref,     # (2*pad_a, 1)        f32
    out_ref,    # (4A+1, tile_b)      f32   [action|mean|log_std|pre_tanh|log_prob]
    *, act_dim, pad_a,
):
    A = act_dim
    cdt = w1_ref.dtype  # matmul operand dtype (f32 or bf16); accumulation is f32

    # layer 1 (transposed): the task-z contribution + b1 was folded into zb1
    # per task outside the kernel, so the concatenated (N, obs+latent) input
    # never exists in HBM.
    h1 = jnp.dot(w1_ref[...], obs_ref[...], preferred_element_type=jnp.float32)
    h1 = jnp.maximum(h1 + zb1_ref[...], 0.0)

    # layer 2 (transposed)
    h2 = jnp.dot(w2_ref[...], h1.astype(cdt), preferred_element_type=jnp.float32)
    h2 = jnp.maximum(h2 + b2_ref[...], 0.0)

    # fused mean / log_std heads (always f32; the weight is tiny)
    heads = jnp.dot(wh_ref[...], h2, preferred_element_type=jnp.float32)
    heads = heads + bh_ref[...]
    mean = heads[0:A, :]
    log_std = jnp.clip(heads[pad_a:pad_a + A, :], LOG_SIG_MIN, LOG_SIG_MAX)
    std = jnp.exp(log_std)

    # reparameterized tanh-Gaussian sample (elementwise math in f32)
    eps = eps_ref[...]
    pre_tanh = mean + std * eps
    action = jnp.tanh(pre_tanh)

    # log prob: Normal(mean, std).log_prob(pre_tanh) - log(1 - tanh^2 + 1e-6)
    normal_lp = -0.5 * eps * eps - log_std - 0.5 * LOG_2PI
    lp = normal_lp - jnp.log(1.0 - action * action + 1e-6)
    log_prob = jnp.sum(lp, axis=0, keepdims=True)

    # single dense full-block store (lane dim = batch; no padding rows)
    out_ref[...] = jnp.concatenate(
        [action, mean, log_std, pre_tanh, log_prob], axis=0)


def hyper_pearl_agent_forward(obs, context, params, eps, *,
                              matmul_dtype=jnp.bfloat16, max_tile_b=1024,
                              return_packed=False):
    """Pallas implementation of HyperPEARLAgent.forward (use_hyper_net=False).

    obs:     (t, b, obs_dim) f32
    context: (t, latent_dim) f32   (one task embedding z per task)
    eps:     (t*b, act_dim)  f32   (standard-normal reparameterization noise)
    params:  PyTorch-layout dict: w1 (in_dim,H), b1 (1,H), w2 (H,H), b2 (1,H),
             wm (H,A), bm (1,A), ws (H,A), bs (1,A)

    Returns ((action, mean, log_std, log_prob, pre_tanh), task_z), each of the
    policy outputs shaped (t*b, ...) like the PyTorch module.  With
    return_packed=True, returns (packed, task_z) where packed is the raw
    feature-major kernel output (t, 4A+1, b) with row offsets
    [0:A]=action, [A:2A]=mean, [2A:3A]=log_std, [3A:4A]=pre_tanh, [4A]=log_prob.
    """
    t, b, obs_dim = obs.shape
    latent_dim = context.shape[1]
    hidden = params["w1"].shape[1]
    act_dim = params["wm"].shape[1]
    A = act_dim
    pad_a = ((A + 7) // 8) * 8
    assert params["w1"].shape[0] == obs_dim + latent_dim
    assert max_tile_b % 128 == 0

    # ---- parameter prep (cheap one-time XLA ops) ----
    w1_obs_t = params["w1"][:obs_dim, :].T.astype(matmul_dtype)      # (H, obs_dim)
    w1_z = params["w1"][obs_dim:, :]                                  # (latent, H) f32
    w2_t = params["w2"].T.astype(matmul_dtype)                        # (H, H)
    b2_t = params["b2"].reshape(hidden, 1).astype(jnp.float32)        # (H, 1)

    # fused heads, sublane-aligned: rows [0:A]=mean head, [pad_a:pad_a+A]=log_std head
    w_heads_t = jnp.zeros((2 * pad_a, hidden), jnp.float32)
    w_heads_t = w_heads_t.at[0:A].set(params["wm"].T)
    w_heads_t = w_heads_t.at[pad_a:pad_a + A].set(params["ws"].T)
    b_heads_t = jnp.zeros((2 * pad_a, 1), jnp.float32)
    b_heads_t = b_heads_t.at[0:A].set(params["bm"].reshape(A, 1))
    b_heads_t = b_heads_t.at[pad_a:pad_a + A].set(params["bs"].reshape(A, 1))

    # per-task layer-1 contribution of (detached) z, with b1 folded in: (t, H, 1)
    zb1 = jax.lax.stop_gradient(context) @ w1_z + params["b1"]
    zb1_t = zb1.astype(jnp.float32)[:, :, None]

    # feature-major ("batch-on-lanes") inputs: every DMA row is lane-dense
    obs_t = jnp.swapaxes(obs, 1, 2).astype(matmul_dtype)              # (t, obs_dim, b)
    eps_t = jnp.swapaxes(eps.reshape(t, b, A), 1, 2).astype(jnp.float32)  # (t, A, b)

    # ---- lane tiling over the per-task batch dimension ----
    tile_b = b if b <= max_tile_b else max_tile_b
    # v7x megacore: guarantee >=2 grid programs when the work is splittable
    if t == 1 and pl.cdiv(b, tile_b) == 1 and b >= 256:
        half = -(-b // 2)
        tile_b = -(-half // 128) * 128
    nb = pl.cdiv(b, tile_b)
    grid = (t, nb)

    n_rows = 4 * A + 1  # [action | mean | log_std | pre_tanh | log_prob]

    row_map = lambda ti, bi: (ti, 0, bi)
    task_map = lambda ti, bi: (ti, 0, 0)
    full2d = lambda ti, bi: (0, 0)

    packed = pl.pallas_call(
        functools.partial(_tanh_gaussian_policy_kernel, act_dim=A, pad_a=pad_a),
        grid=grid,
        in_specs=[
            pl.BlockSpec((None, obs_dim, tile_b), row_map),        # obs^T tile
            pl.BlockSpec((None, A, tile_b), row_map),              # eps^T tile
            pl.BlockSpec((None, hidden, 1), task_map),             # zb1[task]
            pl.BlockSpec((hidden, obs_dim), full2d),               # W1_obs^T
            pl.BlockSpec((hidden, hidden), full2d),                # W2^T
            pl.BlockSpec((hidden, 1), full2d),                     # b2^T
            pl.BlockSpec((2 * pad_a, hidden), full2d),             # fused heads W^T
            pl.BlockSpec((2 * pad_a, 1), full2d),                  # fused heads b^T
        ],
        out_specs=pl.BlockSpec((None, n_rows, tile_b), row_map),
        out_shape=jax.ShapeDtypeStruct((t, n_rows, b), jnp.float32),
        compiler_params=pltpu.CompilerParams(
            dimension_semantics=("parallel", "parallel")),
    )(obs_t, eps_t, zb1_t, w1_obs_t, w2_t, b2_t, w_heads_t, b_heads_t)

    # task_z as returned by HyperPEARLAgent.forward (not detached in the return)
    task_z = jnp.repeat(context, b, axis=0)

    if return_packed:
        return packed, task_z

    def take(lo, hi):
        return jnp.swapaxes(packed[:, lo:hi, :], 1, 2).reshape(t * b, hi - lo)

    action = take(0, A)
    mean = take(A, 2 * A)
    log_std = take(2 * A, 3 * A)
    pre_tanh = take(3 * A, 4 * A)
    log_prob = take(4 * A, 4 * A + 1)
    return (action, mean, log_std, log_prob, pre_tanh), task_z


def make_params(key, in_dim, hidden, act_dim):
    # NOTE: for production PEARL nets choose `hidden` as a multiple of 256
    # (v6e/v7x MXU width); 128 multiples suffice on v5e.
    kw1, kw2, kwm, kws = jax.random.split(key, 4)
    scale = 0.1
    return dict(
        w1=scale * jax.random.normal(kw1, (in_dim, hidden), jnp.float32),
        b1=jnp.zeros((1, hidden), jnp.float32),
        w2=scale * jax.random.normal(kw2, (hidden, hidden), jnp.float32),
        b2=jnp.zeros((1, hidden), jnp.float32),
        wm=scale * jax.random.normal(kwm, (hidden, act_dim), jnp.float32),
        bm=jnp.zeros((1, act_dim), jnp.float32),
        ws=scale * jax.random.normal(kws, (hidden, act_dim), jnp.float32),
        bs=jnp.zeros((1, act_dim), jnp.float32),
    )


def reference_forward(obs, context, params, eps):
    """Pure-JAX reference mirroring the PyTorch forward, for validation."""
    t, b, obs_dim = obs.shape
    obs_flat = obs.reshape(t * b, obs_dim)
    task_z = jnp.repeat(context, b, axis=0)
    x = jnp.concatenate([obs_flat, task_z], axis=1)
    h1 = jax.nn.relu(x @ params["w1"] + params["b1"])
    h2 = jax.nn.relu(h1 @ params["w2"] + params["b2"])
    mean = h2 @ params["wm"] + params["bm"]
    log_std = jnp.clip(h2 @ params["ws"] + params["bs"], LOG_SIG_MIN, LOG_SIG_MAX)
    std = jnp.exp(log_std)
    pre_tanh = mean + std * eps
    action = jnp.tanh(pre_tanh)
    normal_lp = -0.5 * eps * eps - log_std - 0.5 * LOG_2PI
    lp = normal_lp - jnp.log(1.0 - action * action + 1e-6)
    log_prob = jnp.sum(lp, axis=-1, keepdims=True)
    return (action, mean, log_std, log_prob, pre_tanh), task_z


if __name__ == "__main__":
    import numpy as np

    # Small shapes consistent with PEARL: t tasks, b observations per task.
    t, b = 2, 8
    obs_dim, latent_dim, hidden, act_dim = 11, 5, 32, 4
    in_dim = obs_dim + latent_dim

    key = jax.random.PRNGKey(0)
    k_obs, k_ctx, k_eps, k_par = jax.random.split(key, 4)

    obs = jax.random.normal(k_obs, (t, b, obs_dim), jnp.float32)
    context = jax.random.normal(k_ctx, (t, latent_dim), jnp.float32)
    eps = jax.random.normal(k_eps, (t * b, act_dim), jnp.float32)
    params = make_params(k_par, in_dim, hidden, act_dim)

    (a_r, m_r, ls_r, lp_r, pt_r), tz_r = reference_forward(obs, context, params, eps)

    # f32 path: strict validation against the pure-JAX reference
    (action, mean, log_std, log_prob, pre_tanh), task_z = hyper_pearl_agent_forward(
        obs, context, params, eps, matmul_dtype=jnp.float32)
    jax.block_until_ready((action, mean, log_std, log_prob, pre_tanh, task_z))

    np.testing.assert_allclose(np.asarray(action), np.asarray(a_r), rtol=1e-4, atol=1e-4)
    np.testing.assert_allclose(np.asarray(mean), np.asarray(m_r), rtol=1e-4, atol=1e-4)
    np.testing.assert_allclose(np.asarray(log_std), np.asarray(ls_r), rtol=1e-4, atol=1e-4)
    np.testing.assert_allclose(np.asarray(log_prob), np.asarray(lp_r), rtol=1e-4, atol=1e-4)
    np.testing.assert_allclose(np.asarray(pre_tanh), np.asarray(pt_r), rtol=1e-4, atol=1e-4)
    np.testing.assert_allclose(np.asarray(task_z), np.asarray(tz_r), rtol=1e-6, atol=1e-6)

    # default bf16-operand path (heads stay f32): loose smoke check
    (a_b, m_b, ls_b, lp_b, pt_b), _ = hyper_pearl_agent_forward(obs, context, params, eps)
    jax.block_until_ready((a_b, m_b, ls_b, lp_b, pt_b))
    np.testing.assert_allclose(np.asarray(a_b), np.asarray(a_r), rtol=0.0, atol=0.15)
    np.testing.assert_allclose(np.asarray(m_b), np.asarray(m_r), rtol=0.0, atol=0.15)
    np.testing.assert_allclose(np.asarray(pt_b), np.asarray(pt_r), rtol=0.0, atol=0.15)
    np.testing.assert_allclose(np.asarray(lp_b), np.asarray(lp_r), rtol=0.0, atol=1.5)

    # packed (feature-major) return path: shape check only
    packed, _ = hyper_pearl_agent_forward(obs, context, params, eps,
                                          matmul_dtype=jnp.float32, return_packed=True)
    jax.block_until_ready(packed)
    assert packed.shape == (t, 4 * act_dim + 1, b)

    print("KERNEL_OK")
</pallas_src>

<mosaic_0001>
module attributes {stable_mosaic.version = 11 : i64} {
  func.func @_tanh_gaussian_policy_kernel(%arg0: i32, %arg1: i32, %arg2: memref<1x11x8xf32, #tpu.memory_space<vmem>>, %arg3: memref<1x4x8xf32, #tpu.memory_space<vmem>>, %arg4: memref<1x32x1xf32, #tpu.memory_space<vmem>>, %arg5: memref<32x11xf32, #tpu.memory_space<vmem>>, %arg6: memref<32x32xf32, #tpu.memory_space<vmem>>, %arg7: memref<32x1xf32, #tpu.memory_space<vmem>>, %arg8: memref<16x32xf32, #tpu.memory_space<vmem>>, %arg9: memref<16x1xf32, #tpu.memory_space<vmem>>, %arg10: memref<1x17x8xf32, #tpu.memory_space<vmem>>) attributes {dimension_semantics = [#tpu.dimension_semantics<parallel>, #tpu.dimension_semantics<parallel>], iteration_bounds = array<i64: 2, 1>, scalar_prefetch = 0 : i64, scratch_operands = 0 : i64, tpu.core_type = #tpu.core_type<tc>, window_params = [{transform_indices = @transform_0, window_bounds = array<i64: 1, 11, 8>}, {transform_indices = @transform_1, window_bounds = array<i64: 1, 4, 8>}, {transform_indices = @transform_2, window_bounds = array<i64: 1, 32, 1>}, {pipeline_mode = #tpu.pipeline_mode<synchronous>, transform_indices = @transform_3, window_bounds = array<i64: 32, 11>}, {pipeline_mode = #tpu.pipeline_mode<synchronous>, transform_indices = @transform_4, window_bounds = array<i64: 32, 32>}, {pipeline_mode = #tpu.pipeline_mode<synchronous>, transform_indices = @transform_5, window_bounds = array<i64: 32, 1>}, {pipeline_mode = #tpu.pipeline_mode<synchronous>, transform_indices = @transform_6, window_bounds = array<i64: 16, 32>}, {pipeline_mode = #tpu.pipeline_mode<synchronous>, transform_indices = @transform_7, window_bounds = array<i64: 16, 1>}, {transform_indices = @transform_8, window_bounds = array<i64: 1, 17, 8>}]} {
    %c0 = arith.constant 0 : index
    %c0_0 = arith.constant 0 : index
    %0 = vector.load %arg5[%c0, %c0_0] : memref<32x11xf32, #tpu.memory_space<vmem>>, vector<32x11xf32>
    %c0_1 = arith.constant 0 : index
    %c0_2 = arith.constant 0 : index
    %c0_3 = arith.constant 0 : index
    %1 = vector.load %arg2[%c0_1, %c0_2, %c0_3] : memref<1x11x8xf32, #tpu.memory_space<vmem>>, vector<1x11x8xf32>
    %2 = vector.shape_cast %1 : vector<1x11x8xf32> to vector<11x8xf32>
    %cst = arith.constant dense<0.000000e+00> : vector<32x8xf32>
    %3 = tpu.matmul %0, %2, %cst {dimension_numbers = #tpu.dot_dimension_numbers<[1], [0], [0], [1], [0, 0, 1, 1], [], []>} : vector<32x11xf32>, vector<11x8xf32>, vector<32x8xf32> -> vector<32x8xf32>
    %c0_4 = arith.constant 0 : index
    %c0_5 = arith.constant 0 : index
    %c0_6 = arith.constant 0 : index
    %4 = vector.load %arg4[%c0_4, %c0_5, %c0_6] : memref<1x32x1xf32, #tpu.memory_space<vmem>>, vector<1x32x1xf32>
    %5 = vector.shape_cast %4 : vector<1x32x1xf32> to vector<32x1xf32>
    %6 = vector.broadcast %5 : vector<32x1xf32> to vector<32x8xf32>
    %7 = arith.addf %3, %6 : vector<32x8xf32>
    %cst_7 = arith.constant 0.000000e+00 : f32
    %8 = vector.broadcast %cst_7 : f32 to vector<32x8xf32>
    %9 = arith.maximumf %7, %8 : vector<32x8xf32>
    %c0_8 = arith.constant 0 : index
    %c0_9 = arith.constant 0 : index
    %10 = vector.load %arg6[%c0_8, %c0_9] : memref<32x32xf32, #tpu.memory_space<vmem>>, vector<32x32xf32>
    %cst_10 = arith.constant dense<0.000000e+00> : vector<32x8xf32>
    %11 = tpu.matmul %10, %9, %cst_10 {dimension_numbers = #tpu.dot_dimension_numbers<[1], [0], [0], [1], [0, 0, 1, 1], [], []>} : vector<32x32xf32>, vector<32x8xf32>, vector<32x8xf32> -> vector<32x8xf32>
    %c0_11 = arith.constant 0 : index
    %c0_12 = arith.constant 0 : index
    %12 = vector.load %arg7[%c0_11, %c0_12] : memref<32x1xf32, #tpu.memory_space<vmem>>, vector<32x1xf32>
    %13 = vector.broadcast %12 : vector<32x1xf32> to vector<32x8xf32>
    %14 = arith.addf %11, %13 : vector<32x8xf32>
    %cst_13 = arith.constant 0.000000e+00 : f32
    %15 = vector.broadcast %cst_13 : f32 to vector<32x8xf32>
    %16 = arith.maximumf %14, %15 : vector<32x8xf32>
    %c0_14 = arith.constant 0 : index
    %c0_15 = arith.constant 0 : index
    %17 = vector.load %arg8[%c0_14, %c0_15] : memref<16x32xf32, #tpu.memory_space<vmem>>, vector<16x32xf32>
    %cst_16 = arith.constant dense<0.000000e+00> : vector<16x8xf32>
    %18 = tpu.matmul %17, %16, %cst_16 {dimension_numbers = #tpu.dot_dimension_numbers<[1], [0], [0], [1], [0, 0, 1, 1], [], []>} : vector<16x32xf32>, vector<32x8xf32>, vector<16x8xf32> -> vector<16x8xf32>
    %c0_17 = arith.constant 0 : index
    %c0_18 = arith.constant 0 : index
    %19 = vector.load %arg9[%c0_17, %c0_18] : memref<16x1xf32, #tpu.memory_space<vmem>>, vector<16x1xf32>
    %20 = vector.broadcast %19 : vector<16x1xf32> to vector<16x8xf32>
    %21 = arith.addf %18, %20 : vector<16x8xf32>
    %22 = vector.extract_strided_slice %21 {offsets = [0, 0], sizes = [4, 8], strides = [1, 1]} : vector<16x8xf32> to vector<4x8xf32>
    %23 = vector.extract_strided_slice %21 {offsets = [8, 0], sizes = [4, 8], strides = [1, 1]} : vector<16x8xf32> to vector<4x8xf32>
    %cst_19 = arith.constant -2.000000e+01 : f32
    %cst_20 = arith.constant 2.000000e+00 : f32
    %24 = vector.broadcast %cst_19 : f32 to vector<4x8xf32>
    %25 = arith.maximumf %24, %23 : vector<4x8xf32>
    %26 = vector.broadcast %cst_20 : f32 to vector<4x8xf32>
    %27 = arith.minimumf %26, %25 : vector<4x8xf32>
    %28 = math.exp %27 : vector<4x8xf32>
    %c0_21 = arith.constant 0 : index
    %c0_22 = arith.constant 0 : index
    %c0_23 = arith.constant 0 : index
    %29 = vector.load %arg3[%c0_21, %c0_22, %c0_23] : memref<1x4x8xf32, #tpu.memory_space<vmem>>, vector<1x4x8xf32>
    %30 = vector.shape_cast %29 : vector<1x4x8xf32> to vector<4x8xf32>
    %31 = arith.mulf %28, %30 : vector<4x8xf32>
    %32 = arith.addf %22, %31 : vector<4x8xf32>
    %33 = math.tanh %32 : vector<4x8xf32>
    %cst_24 = arith.constant -5.000000e-01 : f32
    %34 = vector.broadcast %cst_24 : f32 to vector<4x8xf32>
    %35 = arith.mulf %34, %30 : vector<4x8xf32>
    %36 = arith.mulf %35, %30 : vector<4x8xf32>
    %37 = arith.subf %36, %27 : vector<4x8xf32>
    %cst_25 = arith.constant 0.918938517 : f32
    %38 = vector.broadcast %cst_25 : f32 to vector<4x8xf32>
    %39 = arith.subf %37, %38 : vector<4x8xf32>
    %40 = arith.mulf %33, %33 : vector<4x8xf32>
    %cst_26 = arith.constant 1.000000e+00 : f32
    %41 = vector.broadcast %cst_26 : f32 to vector<4x8xf32>
    %42 = arith.subf %41, %40 : vector<4x8xf32>
    %cst_27 = arith.constant 9.99999997E-7 : f32
    %43 = vector.broadcast %cst_27 : f32 to vector<4x8xf32>
    %44 = arith.addf %42, %43 : vector<4x8xf32>
    %45 = math.log %44 : vector<4x8xf32>
    %46 = arith.subf %39, %45 : vector<4x8xf32>
    %cst_28 = arith.constant dense<0.000000e+00> : vector<8xf32>
    %47 = vector.multi_reduction <add>, %46, %cst_28 [0] : vector<4x8xf32> to vector<8xf32>
    %48 = vector.shape_cast %47 : vector<8xf32> to vector<1x8xf32>
    %49 = tpu.concatenate %33, %22, %27, %32, %48 in 0 : vector<4x8xf32>, vector<4x8xf32>, vector<4x8xf32>, vector<4x8xf32>, vector<1x8xf32> -> vector<17x8xf32>
    %c0_29 = arith.constant 0 : index
    %c0_30 = arith.constant 0 : index
    %c0_31 = arith.constant 0 : index
    %50 = vector.load %arg10[%c0_29, %c0_30, %c0_31] : memref<1x17x8xf32, #tpu.memory_space<vmem>>, vector<1x17x8xf32>
    %51 = vector.shape_cast %50 : vector<1x17x8xf32> to vector<17x8xf32>
    %52 = vector.shape_cast %49 : vector<17x8xf32> to vector<1x17x8xf32>
    tpu.vector_store %arg10[%c0_29, %c0_30, %c0_31], %52 {strides = array<i32>} : memref<1x17x8xf32, #tpu.memory_space<vmem>>, vector<1x17x8xf32>,
    return
  }
  func.func @transform_0(%arg0: i32, %arg1: i32) -> (i32, i32, i32) {
    %c0_i32 = arith.constant 0 : i32
    %c0_i32_0 = arith.constant 0 : i32
    return %arg0, %c0_i32, %arg1 : i32, i32, i32
  }
  func.func @transform_1(%arg0: i32, %arg1: i32) -> (i32, i32, i32) {
    %c0_i32 = arith.constant 0 : i32
    %c0_i32_0 = arith.constant 0 : i32
    return %arg0, %c0_i32, %arg1 : i32, i32, i32
  }
  func.func @transform_2(%arg0: i32, %arg1: i32) -> (i32, i32, i32) {
    %c0_i32 = arith.constant 0 : i32
    %c0_i32_0 = arith.constant 0 : i32
    %c0_i32_1 = arith.constant 0 : i32
    return %arg0, %c0_i32, %c0_i32_0 : i32, i32, i32
  }
  func.func @transform_3(%arg0: i32, %arg1: i32) -> (i32, i32) {
    %c0_i32 = arith.constant 0 : i32
    %c0_i32_0 = arith.constant 0 : i32
    %c0_i32_1 = arith.constant 0 : i32
    return %c0_i32, %c0_i32_0 : i32, i32
  }
  func.func @transform_4(%arg0: i32, %arg1: i32) -> (i32, i32) {
    %c0_i32 = arith.constant 0 : i32
    %c0_i32_0 = arith.constant 0 : i32
    %c0_i32_1 = arith.constant 0 : i32
    return %c0_i32, %c0_i32_0 : i32, i32
  }
  func.func @transform_5(%arg0: i32, %arg1: i32) -> (i32, i32) {
    %c0_i32 = arith.constant 0 : i32
    %c0_i32_0 = arith.constant 0 : i32
    %c0_i32_1 = arith.constant 0 : i32
    return %c0_i32, %c0_i32_0 : i32, i32
  }
  func.func @transform_6(%arg0: i32, %arg1: i32) -> (i32, i32) {
    %c0_i32 = arith.constant 0 : i32
    %c0_i32_0 = arith.constant 0 : i32
    %c0_i32_1 = arith.constant 0 : i32
    return %c0_i32, %c0_i32_0 : i32, i32
  }
  func.func @transform_7(%arg0: i32, %arg1: i32) -> (i32, i32) {
    %c0_i32 = arith.constant 0 : i32
    %c0_i32_0 = arith.constant 0 : i32
    %c0_i32_1 = arith.constant 0 : i32
    return %c0_i32, %c0_i32_0 : i32, i32
  }
  func.func @transform_8(%arg0: i32, %arg1: i32) -> (i32, i32, i32) {
    %c0_i32 = arith.constant 0 : i32
    %c0_i32_0 = arith.constant 0 : i32
    return %arg0, %c0_i32, %arg1 : i32, i32, i32
  }
}

</mosaic_0001>

<bundles_post_ra>
// kernel: tpu_custom_call.1
= control target key start
LH: loop header
LB: loop body
LE: loop exit
PB: predicated region body
PF: predicated region fallthrough
CT: control target
= control target key end

     0   :  { %s1106_s27 = smov 0   ;;  %s1108_s28 = smov 0   ;;  %s1209_s0 = inlined_call_operand.vmem [shape: f32[2,11,8], index: 0, kind: input, shape index: {}]   ;;  %s1210_s1 = inlined_call_operand.vmem [shape: f32[2,4,8], index: 1, kind: input, shape index: {}]   ;;  %s1211_s2 = inlined_call_operand.vmem [shape: f32[2,32,1], index: 2, kind: input, shape index: {}]   ;;  %s1212_s3 = inlined_call_operand.vmem [shape: f32[32,11], index: 3, kind: input, shape index: {}]   ;;  %s1213_s4 = inlined_call_operand.vmem [shape: f32[32,32], index: 4, kind: input, shape index: {}]   ;;  %s1214_s5 = inlined_call_operand.vmem [shape: f32[32,1], index: 5, kind: input, shape index: {}]   ;;  %s1215_s6 = inlined_call_operand.vmem [shape: f32[16,32], index: 6, kind: input, shape index: {}]   ;;  %s1216_s7 = inlined_call_operand.vmem [shape: f32[16,1], index: 7, kind: input, shape index: {}]   ;;  %s1217_s8 = inlined_call_operand.vmem [shape: f32[2,17,8], index: 8, kind: output, shape index: {}]  }
   0x1   :  { %s1110_s29 = smov 0  }
   0x2 LB: > { %s30_s30 = sadd.s32 1, %s1053_s28  ;;  %p900_p0 = scmp.ge.s32.totalorder %s1057_s29, 1  ;;  %s1057_s29 = sphi %s1110_s29, %s18_s29   ;;  %s1053_s28 = sphi %s1108_s28, %s1219_s28   ;;  %s1049_s27 = sphi %s1106_s27, %s1218_s27  }
   0x3   : > { %p32_p1 = scmp.ge.s32.totalorder %s30_s30, 2  ;;  %p305_p2 = scmp.lt.s32.totalorder %s1057_s29, 3 }
   0x5   : > { %s1221_s30 = smov (%p32_p1, %s30_s30), 0  ;;  %p306_p3 = pnand %p900_p0, %p305_p2 }
   0x6   : > { %p357_p4 = scmp.lt.s32.totalorder (!%p306_p3), %s1049_s27, 1  ;;  %v385_v0 = vld [vmem:[%s1212_s3] sm:$0xff] (!%p306_p3)  ;;  %vm415_vm0 = vcmask (!%p306_p3), 89088   ;;  %vm428_vm1 = vcmask (!%p306_p3), 1042432   ;;  %v1059_v1 = vmov (!%p306_p3), 0   ;;  %vm1060_vm2 = vmmov (!%p306_p3), 1  }
   0x7   : > { %309 = sbr.rel (%p306_p3) target bundleno = 759 (0x2f7), region = 52  ;;  %947 = vmatprep.mubr.msk.f32.mxu0 (!%p306_p3), %vm415_vm0, %v385_v0  ;;  %1027 = vset.pattern.permute.xlu0 (!%p306_p3), %v1059_v1  ;;  %vm979_vm3 = vmpackc.low (!%p306_p3), %vm428_vm1, %vm1060_vm2  ;;  %v386_v9 = vld [vmem:[%s1212_s3 + $0x8] sm:$0xff] (!%p306_p3)  ;;  %v387_v10 = vld [vmem:[%s1212_s3 + $0x10] sm:$0xff] (!%p306_p3)  ;;  %vm549_vm4 = vcmask (!%p306_p3), 261120   ;;  %vm778_vm5 = vcmask (!%p306_p3), 1043456   ;;  %vm781_vm6 = vcmask (!%p306_p3), 64512  }
   0x8   : > { %1028 = vset.pattern.permute.xlu1 (!%p306_p3), %v1059_v1  ;;  %v525_v11 = vld [vmem:[%s1214_s5] sm:$0xff] (!%p306_p3)  ;;  %v526_v12 = vld [vmem:[%s1214_s5 + $0x8] sm:$0xff] (!%p306_p3)  ;;  %v388_v13 = vld [vmem:[%s1212_s3 + $0x18] sm:$0xff] (!%p306_p3)  ;;  %vm764_vm7 = vcmask (!%p306_p3), 60416   ;;  %vm784_vm8 = vcmask (!%p306_p3), 57344  }
   0x9   : > { %v527_v14 = vld [vmem:[%s1214_s5 + $0x10] sm:$0xff] (!%p306_p3)  ;;  %v528_v15 = vld [vmem:[%s1214_s5 + $0x18] sm:$0xff] (!%p306_p3)  ;;  %v654_v16 = vld [vmem:[%s1216_s7 + $0x8] sm:$0xff] (!%p306_p3) }
   0xa   : > { %v653_v17 = vld [vmem:[%s1216_s7] sm:$0xff] (!%p306_p3)  ;;  %v522_v37 = vld [vmem:[%s1213_s4 + $0x8] sm:$0xff] (!%p306_p3)  ;;  %v523_v38 = vld [vmem:[%s1213_s4 + $0x10] sm:$0xff] (!%p306_p3) }
   0xb   : > { %v521_v18 = vld [vmem:[%s1213_s4] sm:$0xff] (!%p306_p3)  ;;  %v524_v39 = vld [vmem:[%s1213_s4 + $0x18] sm:$0xff] (!%p306_p3)  ;;  %v652_v59 = vld [vmem:[%s1215_s6 + $0x8] sm:$0xff] (!%p306_p3) }
   0xc   : > { %961 = vmatprep.mubr.msk.f32.mxu1 (!%p306_p3), %vm549_vm4, %v521_v18  ;;  %v651_v40 = vld [vmem:[%s1215_s6] sm:$0xff] (!%p306_p3) }
   0xe   : > { %s1223_s27 = smov (!%p357_p4, %s1049_s27), 1 }
   0xf   : > { %s921_s11 = sshll.u32 %s1223_s27, 4  ;;  %s922_s12 = sshll.u32 %s1223_s27, 5 }
  0x10   : > { %s364_s15 = scalar_lea.vmem %s1209_s0, %s921_s11  ;;  %s376_s18 = scalar_lea.vmem %s1211_s2, %s922_s12 }
  0x11   : > { %v389_v2 = vld [vmem:[%s364_s15] sm:$0xff]  ;;  %v390_v3 = vld [vmem:[%s364_s15 + $0x8] sm:$0x7]  ;;  %v393_v6 = vld [vmem:[%s376_s18 + $0x10] sm:$0xff]  ;;  %s903_s13 = sshll.u32 %s1223_s27, 2  ;;  %s1000_s17 = smul.u32 24, %s1223_s27 }
  0x12   : > { %v391_v4 = vld [vmem:[%s376_s18] sm:$0xff]  ;;  %v978_v5 = vpack.c.bf16 %v390_v3, %v389_v2  ;;  %407 = vperm.xlu1 %1028, %v393_v6   ;;  %v392_v7 = vld [vmem:[%s376_s18 + $0x8] sm:$0xff]  ;;  %v394_v8 = vld [vmem:[%s376_s18 + $0x18] sm:$0xff]  ;;  %s371_s16 = scalar_lea.vmem %s1210_s1, %s903_s13 }
  0x13   : > { %397 = vperm.xlu0 %1027, %v391_v4   ;;  %s384_s20 = scalar_lea.vmem %s1217_s8, %s1000_s17 }
  0x14   : > { %980 = vmatprep.subr.msk.bf16.mxu0 %vm979_vm3, %v978_v5 }
  0x15   : > { %983 = vmatpush3.bf16.msk.msra.mxu0 %vm979_vm3, %v978_v5  ;;  %v750_v5 = vld [vmem:[%s371_s16] sm:$0xf] }
  0x16   : > { %412 = vperm.xlu1 %1028, %v394_v8  }
  0x17   : > { %402 = vperm.xlu0 %1027, %v392_v7  }
  0x18   : > { %948 = vmatmul.mubr.msk.f32.vlgmr.msra.gmra.mrb[0].mxu0 %vm415_vm0, %v386_v9 }
  0x19   : > { %950 = vmatprep.mubr.msk.f32.mxu0 %vm415_vm0, %v387_v10 }
  0x1a   : > { %536 = vperm.xlu1 %1028, %v526_v12  }
  0x1b   : > { %531 = vperm.xlu0 %1027, %v525_v11  }
  0x1c   : > { %951 = vmatmul.mubr.msk.f32.gmra.mrb[2].mxu0 %vm415_vm0, %v388_v13 }
  0x1d   : > { %975 = vmatprep.mubr.msk.f32.mxu0 %vm549_vm4, %v651_v40 }
  0x1e   : > { %546 = vperm.xlu1 %1028, %v528_v15  }
  0x1f   : > { %541 = vperm.xlu0 %1027, %v527_v14  }
  0x22   : > { %657 = vperm.xlu1 %1028, %v653_v17   ;;  %v754_v17 = vmul.f32 -0.5, %v750_v5 }
  0x23   : > { %662 = vperm.xlu0 %1027, %v654_v16  }
  0x24   : > { %v755_v18 = vmul.f32 %v754_v17, %v750_v5 }
  0x91   : > { %v408_v20 = vpop.permute.xlu1 %407 }
  0x92   : > { %v398_v19 = vpop.permute.xlu0 %397 }
  0x95   : > { %v413_v27 = vpop.permute.xlu1 %412 }
  0x96   : > { %v403_v21 = vpop.permute.xlu0 %402 }
  0x99   : > { %v537_v41 = vpop.permute.xlu1 %536 }
  0x9a   : > { %v532_v42 = vpop.permute.xlu0 %531 }
  0x9d   : > { %v547_v48 = vpop.permute.xlu1 %546 }
  0x9e   : > { %v542_v51 = vpop.permute.xlu0 %541 }
  0xa1   : > { %v658_v4 = vpop.permute.xlu1 %657 }
  0xa2   : > { %v663_v60 = vpop.permute.xlu0 %662 }
  0xeb   : > { %v949_v22 = vpop.f32.mrb[0].mxu0 }
  0xec   : > { %v504_v23 = vadd.f32 %v949_v22, %v403_v21  ;;  %v498_v24 = vpop.f32.mrb[1].mxu0 }
  0xed   : > { %v499_v25 = vadd.f32 %v498_v24, %v398_v19 }
  0xee   : > { %v518_v26 = vmax.f32 %v504_v23, 0.0 }
  0xef   : > { %v517_v28 = vmax.f32 %v499_v25, 0.0  ;;  %v952_v29 = vpop.f32.mrb[2].mxu0 }
  0xf0   : > { %v514_v30 = vadd.f32 %v952_v29, %v413_v27  ;;  %v508_v31 = vpop.f32.mrb[3].mxu0 }
  0xf1   : > { %v509_v32 = vadd.f32 %v508_v31, %v408_v20  ;;  %v984_v33 = vpack.c.bf16 %v518_v26, %v517_v28 }
  0xf2   : > { %v520_v34 = vmax.f32 %v514_v30, 0.0 }
  0xf3   : > { %v519_v35 = vmax.f32 %v509_v32, 0.0  ;;  %985 = vmatprep.subr.bf16.mxu1 %v984_v33 }
  0xf4   : > { %987 = vmatpush3.bf16.msra.mxu1 %v984_v33 }
  0xf5   : > { %v988_v36 = vpack.c.bf16 %v520_v34, %v519_v35 }
  0xf7   : > { %989 = vmatprep.subr.bf16.mxu1 %v988_v36 }
  0xf8   : > { %991 = vmatpush3.bf16.msra.mxu1 %v988_v36 }
  0xfb   : > { %962 = vmatmul.mubr.msk.f32.vlgmr.msra.gmra.mrb[0].mxu1 %vm549_vm4, %v522_v37 }
  0xfc   : > { %964 = vmatprep.mubr.msk.f32.mxu1 %vm549_vm4, %v523_v38 }
  0xff   : > { %965 = vmatmul.mubr.msk.f32.gmra.mrb[2].mxu1 %vm549_vm4, %v524_v39 }
 0x1ce   : > { %v963_v43 = vpop.f32.mrb[0].mxu1 }
 0x1cf   : > { %v634_v44 = vadd.f32 %v963_v43, %v537_v41  ;;  %v628_v45 = vpop.f32.mrb[1].mxu1 }
 0x1d0   : > { %v629_v46 = vadd.f32 %v628_v45, %v532_v42 }
 0x1d1   : > { %v648_v47 = vmax.f32 %v634_v44, 0.0 }
 0x1d2   : > { %v647_v49 = vmax.f32 %v629_v46, 0.0  ;;  %v966_v50 = vpop.f32.mrb[2].mxu1 }
 0x1d3   : > { %v644_v52 = vadd.f32 %v966_v50, %v547_v48  ;;  %v638_v53 = vpop.f32.mrb[3].mxu1 }
 0x1d4   : > { %v992_v54 = vpack.c.bf16 %v648_v47, %v647_v49  ;;  %v639_v55 = vadd.f32 %v638_v53, %v542_v51 }
 0x1d5   : > { %v650_v56 = vmax.f32 %v644_v52, 0.0 }
 0x1d6   : > { %v649_v57 = vmax.f32 %v639_v55, 0.0  ;;  %993 = vmatprep.subr.bf16.mxu0 %v992_v54 }
 0x1d7   : > { %995 = vmatpush3.bf16.msra.mxu0 %v992_v54 }
 0x1d8   : > { %v996_v58 = vpack.c.bf16 %v650_v56, %v649_v57 }
 0x1da   : > { %997 = vmatprep.subr.bf16.mxu0 %v996_v58 }
 0x1db   : > { %999 = vmatpush3.bf16.msra.mxu0 %v996_v58 }
 0x1de   : > { %976 = vmatmul.mubr.msk.f32.vlgmr.msra.gmra.mrb[4].mxu0 %vm549_vm4, %v652_v59 }
 0x2b1   : > { %v977_v61 = vpop.f32.mrb[4].mxu0 }
 0x2b2   : > { %v743_v62 = vadd.f32 %v977_v61, %v663_v60  ;;  %v737_v63 = vpop.f32.mrb[5].mxu0 }
 0x2b3   : > { %v738_v6 = vadd.f32 %v737_v63, %v658_v4 }
 0x2b4   : > { %v746_v0 = vmax.f32 %v743_v62, -20.0 }
 0x2b5   : > { %v773_v11 = vrot.slane %v738_v6, 4 }
 0x2b6   : > { %v747_v1 = vmin.f32 %v746_v0, 2.0 }
 0x2b8   : > { %v748_v2 = vmul.f32 1.442695, %v747_v1  ;;  %v756_v19 = vsub.f32 %v755_v18, %v747_v1 }
 0x2ba   : > { %1029 = vpow2.f32 %v748_v2  ;;  %v918_v21 = vadd.f32 -0.9189385, %v756_v19 }
 0x2c4   : > { %v1030_v3 = vpop.eup %1029 }
 0x2c5   : > { %v751_v7 = vmul.f32 %v1030_v3, %v750_v5 }
 0x2c7   : > { %v752_v8 = vadd.f32 %v751_v7, %v738_v6 }
 0x2c9   : > { %1031 = vtanh.f32 %v752_v8  ;;  %v776_v9 = vrot.slane %v752_v8, 4 }
 0x2cb   : > { %v780_v10 = vsel %vm778_vm5, %v747_v1, %v776_v9 }
 0x2cc   : > { %783 = vst.msk [vmem:[%s384_s20 + $0x8] sm:$0xff] %vm781_vm6, %v780_v10 }
 0x2d3   : > { %v1032_v12 = vpop.eup %1031 }
 0x2d4   : > { %v758_v13 = vmul.f32 %v1032_v12, %v1032_v12  ;;  %v779_v14 = vsel %vm778_vm5, %v1032_v12, %v773_v11 }
 0x2d5   : > { %782 = vst.msk [vmem:[%s384_s20] sm:$0xff] %vm781_vm6, %v779_v14 }
 0x2d6   : > { %v759_v15 = vsub.f32 1.0, %v758_v13 }
 0x2d8   : > { %v760_v16 = vadd.f32 1e-06, %v759_v15 }
 0x2da   : > { %1033 = vlog2.f32 %v760_v16 }
 0x2e4   : > { %v1034_v20 = vpop.eup %1033 }
 0x2e5   : > { %v762_v22 = vmul.f32 0.6931472, %v1034_v20 }
 0x2e7   : > { %v763_v23 = vsub.f32 %v918_v21, %v762_v22 }
 0x2e9   : > { %v765_v24 = vsel %vm764_vm7, %v763_v23, 0.0 }
 0x2ea   : > { %v766_v25 = vrot.slane %v765_v24, 4 }
 0x2ec   : > { %v767_v26 = vadd.f32 %v766_v25, %v765_v24 }
 0x2ee   : > { %v768_v27 = vrot.slane %v767_v26, 2 }
 0x2f0   : > { %v769_v28 = vadd.f32 %v768_v27, %v767_v26 }
 0x2f2   : > { %v770_v29 = vrot.slane %v769_v28, 1 }
 0x2f4   : > { %v771_v30 = vadd.f32 %v770_v29, %v769_v28 }
 0x2f6   : > { %785 = vst.msk [vmem:[%s384_s20 + $0x10] sm:$0x1] %vm784_vm8, %v771_v30 }
 0x2f7 PF: > { %s18_s29 = sadd.s32 1, %s1057_s29   ;;  %s1218_s27 = smov %s1053_s28 }
 0x2f8   : > { %p15_p5 = scmp.ge.s32.totalorder %s18_s29, 4   ;;  %s1219_s28 = smov %s1221_s30 }
 0x2fa   :  { %17 = sbr.rel (!%p15_p5) target bundleno = 2 (0x2), region = 88 }

</bundles_post_ra>
